<compile_context>
chip_gen: v7x
topology: tpu7x:2x2x1
jax: 0.10.0
libtpu: 0.0.40
codegen_flags: <defaults>
</compile_context>

<pallas_src>
import functools

import jax
import jax.numpy as jnp
from jax import lax
from jax.experimental import pallas as pl
from jax.experimental.pallas import tpu as pltpu


def _boundary_loss_kernel(pred_ref, tgt_ref, halo_ref, out_ref, *, theta):
    # pred_ref : (1, TH, W)   logits for one H-tile of one batch element
    # tgt_ref  : (1, TH, W)   target mask tile (same rows as pred)
    # halo_ref : (1, 2, W)    target row just above / just below this tile
    #                         (already zero at the true image borders)
    # out_ref  : (1, 1, 128)  lane-dense per-tile partial sum (broadcast)
    _, TH, W = pred_ref.shape

    x = pred_ref[0].astype(jnp.float32)          # (TH, W)
    t = tgt_ref[0].astype(jnp.float32)           # (TH, W)
    halo = halo_ref[0].astype(jnp.float32)       # (2, W)

    # Halo-extended tile: the extra rows already encode the conv2d zero
    # padding, so the vertical pass needs no masking whatsoever.
    t_ext = jnp.concatenate([halo[0:1, :], t, halo[1:2, :]], axis=0)  # (TH+2, W)

    # Column-boundary multipliers, built ONCE as (1, W) (no (H,W) iotas, no
    # per-shift compare/select chains -- just one VALU multiply per shift).
    col = lax.broadcasted_iota(jnp.int32, (1, W), 1)
    m_left = (col > 0).astype(jnp.float32)       # valid where a[., w-1] exists
    m_right = (col < W - 1).astype(jnp.float32)  # valid where a[., w+1] exists

    # Horizontal Sobel pass (lane-axis rolls run on the XLU slot).
    t_l = pltpu.roll(t_ext, shift=1, axis=1) * m_left        # t_ext[., w-1]
    t_r = pltpu.roll(t_ext, shift=W - 1, axis=1) * m_right   # t_ext[., w+1]
    hdiff = t_r - t_l                        # [-1, 0, 1] along W
    hblur = t_l + 2.0 * t_ext + t_r          # [ 1, 2, 1] along W

    # Vertical Sobel pass: static slices of the halo-extended arrays.
    edge_x = hdiff[0:TH, :] + 2.0 * hdiff[1:TH + 1, :] + hdiff[2:TH + 2, :]
    edge_y = hblur[2:TH + 2, :] - hblur[0:TH, :]

    # sqrt(ex^2 + ey^2) > 0.5  <=>  ex^2 + ey^2 > 0.25  (saves one EUP op)
    mag2 = edge_x * edge_x + edge_y * edge_y
    weights = 1.0 + theta * (mag2 > 0.25).astype(jnp.float32)

    # Stable binary_cross_entropy_with_logits, reduction='none':
    #   max(x, 0) - x*y + log1p(exp(-|x|))
    bce = jnp.maximum(x, 0.0) - x * t + jnp.log1p(jnp.exp(-jnp.abs(x)))

    part = jnp.sum(bce * weights)
    out_ref[...] = jnp.full((1, 1, 128), part, dtype=jnp.float32)


def _pick_tile_h(H, max_tile=256):
    """Largest H-tile <= max_tile dividing H; multiple of 8 unless it is H."""
    if H <= max_tile:
        return H
    for th in range(max_tile, 7, -1):
        if H % th == 0 and th % 8 == 0:
            return th
    # TODO(synk): ragged H with no 8-multiple divisor falls back to a single
    # full-image block; typical segmentation sizes (powers of two) never hit this.
    return H


def boundary_loss(pred, target, theta=3.0, max_tile_h=256):
    """pred, target: [B, H, W] (or [B, 1, H, W]) logits / mask -> scalar loss.

    pred may be bf16 and target may be int8/bool; the kernel up-casts to f32
    internally (required on v5e anyway), so feeding low-precision inputs cuts
    HBM traffic on bandwidth-bound chips.
    """
    if pred.ndim == 4:
        pred = pred[:, 0]
    if target.ndim == 4:
        target = target[:, 0]
    B, H, W = pred.shape

    TH = _pick_tile_h(H, max_tile_h)
    nt = H // TH

    # Halo rows for each H-tile: the target row just above and just below it
    # (zeros at the true image borders).  Only 2 extra rows per TH-row tile of
    # HBM traffic -- negligible, and it makes tiles fully independent.
    tpad = jnp.pad(target, ((0, 0), (1, 1), (0, 0)))            # (B, H+2, W)
    top = tpad[:, 0:H:TH, :]                                    # row t*TH - 1
    bot = tpad[:, TH + 1:H + 2:TH, :]                           # row (t+1)*TH
    halo = jnp.stack([top, bot], axis=2).reshape(B * nt, 2, W)  # (B*nt, 2, W)

    # With TH <= 256 the per-step working set (2 inputs x 2 pipeline buffers
    # + ~10 f32 tile temporaries) stays well under the default scoped VMEM on
    # every generation (incl. v7x's 64 MiB physical); 32 MiB only helps v5e
    # whose default scoped limit is 16 MiB.
    partial = pl.pallas_call(
        functools.partial(_boundary_loss_kernel, theta=float(theta)),
        out_shape=jax.ShapeDtypeStruct((B * nt, 1, 128), jnp.float32),
        grid=(B, nt),
        in_specs=[
            pl.BlockSpec((1, TH, W), lambda b, t: (b, t, 0)),
            pl.BlockSpec((1, TH, W), lambda b, t: (b, t, 0)),
            pl.BlockSpec((1, 2, W), lambda b, t: (b * nt + t, 0, 0)),
        ],
        out_specs=pl.BlockSpec((1, 1, 128), lambda b, t: (b * nt + t, 0, 0)),
        compiler_params=pltpu.CompilerParams(
            dimension_semantics=("parallel", "parallel"),
            vmem_limit_bytes=32 * 1024 * 1024,
        ),
    )(pred, target, halo)

    # Global mean: sum per-tile partials, divide by the GLOBAL element count.
    return jnp.sum(partial[:, 0, 0]) / float(B * H * W)


def boundary_loss_ref(pred, target, theta=3.0):
    """Pure-JAX reference mirroring the PyTorch module."""
    pred = pred.astype(jnp.float32)
    target = target.astype(jnp.float32)
    tp = jnp.pad(target, ((0, 0), (1, 1), (1, 1)))
    B, H, W = pred.shape

    def nb(a, b):
        return tp[:, a:a + H, b:b + W]

    edge_x = (-nb(0, 0) + nb(0, 2) - 2 * nb(1, 0) + 2 * nb(1, 2)
              - nb(2, 0) + nb(2, 2))
    edge_y = (-nb(0, 0) - 2 * nb(0, 1) - nb(0, 2)
              + nb(2, 0) + 2 * nb(2, 1) + nb(2, 2))
    boundary = (jnp.sqrt(edge_x ** 2 + edge_y ** 2) > 0.5).astype(jnp.float32)
    weights = 1.0 + theta * boundary
    bce = (jnp.maximum(pred, 0.0) - pred * target
           + jnp.log1p(jnp.exp(-jnp.abs(pred))))
    return jnp.mean(bce * weights)


if __name__ == "__main__":
    key = jax.random.PRNGKey(0)
    k_pred, k_tgt, k_pred2, k_tgt2 = jax.random.split(key, 4)

    # Single-tile path (nt == 1).
    B, H, W = 2, 16, 16
    pred = jax.random.normal(k_pred, (B, H, W), dtype=jnp.float32)
    target = (jax.random.uniform(k_tgt, (B, H, W)) > 0.5).astype(jnp.float32)
    loss = jax.block_until_ready(boundary_loss(pred, target))
    ref = boundary_loss_ref(pred, target)
    assert jnp.allclose(loss, ref, rtol=1e-5, atol=1e-5), (loss, ref)

    # Multi-tile path (H-tiled grid with interior halo rows).
    B2, H2, W2 = 2, 32, 16
    pred2 = jax.random.normal(k_pred2, (B2, H2, W2), dtype=jnp.float32)
    target2 = (jax.random.uniform(k_tgt2, (B2, H2, W2)) > 0.5).astype(jnp.float32)
    loss2 = jax.block_until_ready(boundary_loss(pred2, target2, max_tile_h=8))
    ref2 = boundary_loss_ref(pred2, target2)
    assert jnp.allclose(loss2, ref2, rtol=1e-5, atol=1e-5), (loss2, ref2)

    print("KERNEL_OK")
</pallas_src>

<mosaic_0001>
module attributes {stable_mosaic.version = 11 : i64} {
  func.func @_boundary_loss_kernel(%arg0: i32, %arg1: i32, %arg2: memref<1x16x16xf32, #tpu.memory_space<vmem>>, %arg3: memref<1x16x16xf32, #tpu.memory_space<vmem>>, %arg4: memref<1x2x16xf32, #tpu.memory_space<vmem>>, %arg5: memref<1x1x128xf32, #tpu.memory_space<vmem>>) attributes {dimension_semantics = [#tpu.dimension_semantics<parallel>, #tpu.dimension_semantics<parallel>], iteration_bounds = array<i64: 2, 1>, scalar_prefetch = 0 : i64, scratch_operands = 0 : i64, tpu.core_type = #tpu.core_type<tc>, window_params = [{transform_indices = @transform_0, window_bounds = array<i64: 1, 16, 16>}, {transform_indices = @transform_1, window_bounds = array<i64: 1, 16, 16>}, {transform_indices = @transform_2, window_bounds = array<i64: 1, 2, 16>}, {transform_indices = @transform_3, window_bounds = array<i64: 1, 1, 128>}]} {
    %c0 = arith.constant 0 : index
    %c0_0 = arith.constant 0 : index
    %c0_1 = arith.constant 0 : index
    %0 = vector.load %arg2[%c0, %c0_0, %c0_1] : memref<1x16x16xf32, #tpu.memory_space<vmem>>, vector<1x16x16xf32>
    %1 = vector.shape_cast %0 : vector<1x16x16xf32> to vector<16x16xf32>
    %c0_2 = arith.constant 0 : index
    %c0_3 = arith.constant 0 : index
    %c0_4 = arith.constant 0 : index
    %2 = vector.load %arg3[%c0_2, %c0_3, %c0_4] : memref<1x16x16xf32, #tpu.memory_space<vmem>>, vector<1x16x16xf32>
    %3 = vector.shape_cast %2 : vector<1x16x16xf32> to vector<16x16xf32>
    %c0_5 = arith.constant 0 : index
    %c0_6 = arith.constant 0 : index
    %c0_7 = arith.constant 0 : index
    %4 = vector.load %arg4[%c0_5, %c0_6, %c0_7] : memref<1x2x16xf32, #tpu.memory_space<vmem>>, vector<1x2x16xf32>
    %5 = vector.shape_cast %4 : vector<1x2x16xf32> to vector<2x16xf32>
    %6 = vector.extract_strided_slice %5 {offsets = [0, 0], sizes = [1, 16], strides = [1, 1]} : vector<2x16xf32> to vector<1x16xf32>
    %7 = vector.extract_strided_slice %5 {offsets = [1, 0], sizes = [1, 16], strides = [1, 1]} : vector<2x16xf32> to vector<1x16xf32>
    %8 = tpu.concatenate %6, %3, %7 in 0 : vector<1x16xf32>, vector<16x16xf32>, vector<1x16xf32> -> vector<18x16xf32>
    %9 = tpu.iota {dimensions = array<i32: 1>} : vector<1x16xi32>
    %c0_i32 = arith.constant 0 : i32
    %10 = vector.broadcast %c0_i32 : i32 to vector<1x16xi32>
    %11 = arith.cmpi sgt, %9, %10 : vector<1x16xi32>
    %12 = arith.extui %11 : vector<1x16xi1> to vector<1x16xi32>
    %13 = arith.sitofp %12 : vector<1x16xi32> to vector<1x16xf32>
    %c15_i32 = arith.constant 15 : i32
    %14 = vector.broadcast %c15_i32 : i32 to vector<1x16xi32>
    %15 = arith.cmpi slt, %9, %14 : vector<1x16xi32>
    %16 = arith.extui %15 : vector<1x16xi1> to vector<1x16xi32>
    %17 = arith.sitofp %16 : vector<1x16xi32> to vector<1x16xf32>
    %c1_i32 = arith.constant 1 : i32
    %18 = tpu.dynamic_rotate %8 by %c1_i32 dim 1 : vector<18x16xf32>, i32 -> vector<18x16xf32>
    %19 = vector.broadcast %13 : vector<1x16xf32> to vector<18x16xf32>
    %20 = arith.mulf %18, %19 : vector<18x16xf32>
    %c15_i32_8 = arith.constant 15 : i32
    %21 = tpu.dynamic_rotate %8 by %c15_i32_8 dim 1 : vector<18x16xf32>, i32 -> vector<18x16xf32>
    %22 = vector.broadcast %17 : vector<1x16xf32> to vector<18x16xf32>
    %23 = arith.mulf %21, %22 : vector<18x16xf32>
    %24 = arith.subf %23, %20 : vector<18x16xf32>
    %cst = arith.constant 2.000000e+00 : f32
    %25 = vector.broadcast %cst : f32 to vector<18x16xf32>
    %26 = arith.mulf %25, %8 : vector<18x16xf32>
    %27 = arith.addf %20, %26 : vector<18x16xf32>
    %28 = arith.addf %27, %23 : vector<18x16xf32>
    %29 = vector.extract_strided_slice %24 {offsets = [0, 0], sizes = [16, 16], strides = [1, 1]} : vector<18x16xf32> to vector<16x16xf32>
    %30 = vector.extract_strided_slice %24 {offsets = [1, 0], sizes = [16, 16], strides = [1, 1]} : vector<18x16xf32> to vector<16x16xf32>
    %cst_9 = arith.constant 2.000000e+00 : f32
    %31 = vector.broadcast %cst_9 : f32 to vector<16x16xf32>
    %32 = arith.mulf %31, %30 : vector<16x16xf32>
    %33 = arith.addf %29, %32 : vector<16x16xf32>
    %34 = vector.extract_strided_slice %24 {offsets = [2, 0], sizes = [16, 16], strides = [1, 1]} : vector<18x16xf32> to vector<16x16xf32>
    %35 = arith.addf %33, %34 : vector<16x16xf32>
    %36 = vector.extract_strided_slice %28 {offsets = [2, 0], sizes = [16, 16], strides = [1, 1]} : vector<18x16xf32> to vector<16x16xf32>
    %37 = vector.extract_strided_slice %28 {offsets = [0, 0], sizes = [16, 16], strides = [1, 1]} : vector<18x16xf32> to vector<16x16xf32>
    %38 = arith.subf %36, %37 : vector<16x16xf32>
    %39 = arith.mulf %35, %35 : vector<16x16xf32>
    %40 = arith.mulf %38, %38 : vector<16x16xf32>
    %41 = arith.addf %39, %40 : vector<16x16xf32>
    %cst_10 = arith.constant 2.500000e-01 : f32
    %42 = vector.broadcast %cst_10 : f32 to vector<16x16xf32>
    %43 = arith.cmpf ogt, %41, %42 : vector<16x16xf32>
    %44 = arith.extui %43 : vector<16x16xi1> to vector<16x16xi32>
    %45 = arith.sitofp %44 : vector<16x16xi32> to vector<16x16xf32>
    %cst_11 = arith.constant 3.000000e+00 : f32
    %46 = vector.broadcast %cst_11 : f32 to vector<16x16xf32>
    %47 = arith.mulf %46, %45 : vector<16x16xf32>
    %cst_12 = arith.constant 1.000000e+00 : f32
    %48 = vector.broadcast %cst_12 : f32 to vector<16x16xf32>
    %49 = arith.addf %48, %47 : vector<16x16xf32>
    %cst_13 = arith.constant 0.000000e+00 : f32
    %50 = vector.broadcast %cst_13 : f32 to vector<16x16xf32>
    %51 = arith.maximumf %1, %50 : vector<16x16xf32>
    %52 = arith.mulf %1, %3 : vector<16x16xf32>
    %53 = arith.subf %51, %52 : vector<16x16xf32>
    %54 = math.absf %1 : vector<16x16xf32>
    %cst_14 = arith.constant 0.000000e+00 : f32
    %55 = vector.broadcast %cst_14 : f32 to vector<16x16xf32>
    %56 = arith.subf %55, %54 : vector<16x16xf32>
    %57 = math.exp %56 : vector<16x16xf32>
    %58 = math.log1p %57 : vector<16x16xf32>
    %59 = arith.addf %53, %58 : vector<16x16xf32>
    %60 = arith.mulf %59, %49 : vector<16x16xf32>
    %61 = vector.shape_cast %60 : vector<16x16xf32> to vector<1x16x16xf32>
    %cst_15 = arith.constant dense<0.000000e+00> : vector<1xf32>
    %62 = vector.multi_reduction <add>, %61, %cst_15 [1, 2] : vector<1x16x16xf32> to vector<1xf32>
    %63 = vector.shape_cast %62 : vector<1xf32> to vector<1x1x1xf32>
    %64 = vector.extract %63[0, 0, 0] : f32 from vector<1x1x1xf32>
    %65 = vector.broadcast %64 : f32 to vector<1x1x128xf32>
    %c0_16 = arith.constant 0 : index
    %c0_17 = arith.constant 0 : index
    %c0_18 = arith.constant 0 : index
    %66 = vector.load %arg5[%c0_16, %c0_17, %c0_18] : memref<1x1x128xf32, #tpu.memory_space<vmem>>, vector<1x1x128xf32>
    tpu.vector_store %arg5[%c0_16, %c0_17, %c0_18], %65 {strides = array<i32>} : memref<1x1x128xf32, #tpu.memory_space<vmem>>, vector<1x1x128xf32>,
    return
  }
  func.func @transform_0(%arg0: i32, %arg1: i32) -> (i32, i32, i32) {
    %c0_i32 = arith.constant 0 : i32
    %c0_i32_0 = arith.constant 0 : i32
    return %arg0, %arg1, %c0_i32 : i32, i32, i32
  }
  func.func @transform_1(%arg0: i32, %arg1: i32) -> (i32, i32, i32) {
    %c0_i32 = arith.constant 0 : i32
    %c0_i32_0 = arith.constant 0 : i32
    return %arg0, %arg1, %c0_i32 : i32, i32, i32
  }
  func.func @transform_2(%arg0: i32, %arg1: i32) -> (i32, i32, i32) {
    %c1_i32 = arith.constant 1 : i32
    %0 = arith.muli %arg0, %c1_i32 : i32
    %1 = arith.addi %0, %arg1 : i32
    %c0_i32 = arith.constant 0 : i32
    %c0_i32_0 = arith.constant 0 : i32
    %c0_i32_1 = arith.constant 0 : i32
    return %1, %c0_i32, %c0_i32_0 : i32, i32, i32
  }
  func.func @transform_3(%arg0: i32, %arg1: i32) -> (i32, i32, i32) {
    %c1_i32 = arith.constant 1 : i32
    %0 = arith.muli %arg0, %c1_i32 : i32
    %1 = arith.addi %0, %arg1 : i32
    %c0_i32 = arith.constant 0 : i32
    %c0_i32_0 = arith.constant 0 : i32
    %c0_i32_1 = arith.constant 0 : i32
    return %1, %c0_i32, %c0_i32_0 : i32, i32, i32
  }
}

</mosaic_0001>

<bundles_post_ra>
// kernel: tpu_custom_call.1
= control target key start
LH: loop header
LB: loop body
LE: loop exit
PB: predicated region body
PF: predicated region fallthrough
CT: control target
= control target key end

     0   :  { %8 = vsyncpa [#allocation3], 0  ;;  %s1203_s0 = inlined_call_operand.hbm [shape: f32[2,16,16], index: 0, kind: input, shape index: {}]   ;;  %s1204_s1 = inlined_call_operand.hbm [shape: f32[2,16,16], index: 1, kind: input, shape index: {}]   ;;  %s1205_s2 = inlined_call_operand.vmem [shape: f32[2,2,16], index: 2, kind: input, shape index: {}]   ;;  %s1206_s3 = inlined_call_operand.hbm [shape: f32[2,1,128], index: 3, kind: output, shape index: {}]  }
   0x1   :  { %10 = vsyncpa [#allocation3 + $0x1], 0 }
   0x2   :  { %11 = vsyncpa [#allocation6], 0 }
   0x3   :  { %13 = vsyncpa [#allocation6 + $0x1], 0 }
   0x4   :  { %14 = vsyncpa [#allocation4], 0 }
   0x5   :  { %16 = vsyncpa [#allocation4 + $0x1], 0  ;;  %s932_s12 = smov 0   ;;  %s934_s13 = smov 0  }
   0x6   :  { %s936_s14 = smov 0   ;;  %s938_s15 = smov 0  }
   0x7   :  { %s940_s16 = smov 0   ;;  %s942_s17 = smov 0  }
   0x8 LB: > { %s643_s18 = sadd.s32 4294967295, %s898_s17   ;;  %s644_s19 = sadd.s32 4294967294, %s898_s17   ;;  %s898_s17 = sphi %s942_s17, %s22_s17   ;;  %s894_s16 = sphi %s940_s16, %s1224_s16   ;;  %s890_s15 = sphi %s938_s15, %s1223_s15   ;;  %s886_s14 = sphi %s936_s14, %s1222_s14   ;;  %s882_s13 = sphi %s934_s13, %s1221_s13   ;;  %s878_s12 = sphi %s932_s12, %s1220_s12  }
   0x9   : > { %s34_s20 = sadd.s32 1, %s894_s16  ;;  %s43_s21 = sadd.s32 1, %s886_s14 }
   0xa   : > { %p36_p0 = scmp.ge.s32.totalorder %s34_s20, 2  ;;  %p50_p1 = scmp.ne.s32.totalorder %s886_s14, %s882_s13 }
   0xb   : > { %p51_p2 = scmp.eq.s32.totalorder %s898_s17, 0  ;;  %p56_p3 = scmp.ne.s32.totalorder %s882_s13, %s878_s12 }
   0xc   : > { %s1226_s20 = smov (%p36_p0, %s34_s20), 0  ;;  %p57_p5 = scmp.eq.s32.totalorder %s643_s18, 0 }
   0xd   : > { %p973_p4 = por %p51_p2, %p50_p1  ;;  %s38_s23 = ssub.s32 %s894_s16, %s1226_s20 }
   0xe   : > { %p138_p6 = scmp.eq.s32.totalorder %s643_s18, 1  ;;  %p41_p7 = scmp.eq.s32.totalorder %s38_s23, 0 }
   0xf   : > { %p979_p8 = por %p57_p5, %p56_p3  ;;  %p144_p10 = scmp.eq.s32.totalorder %s644_s19, 1 }
  0x10   : > { %p983_p9 = por %p138_p6, %p50_p1  ;;  %p685_p13 = scmp.lt.s32.totalorder %s898_s17, 2 }
  0x11   : > { %s1210_s24 = scalar_select %p979_p8, 1, 0 }
  0x12   : > { %s1211_s25 = scalar_select %p983_p9, 1, 0 }
  0x13   : > { %s988_s26 = scalar_select %p41_p7, %s886_s14, %s43_s21  }
  0x14   : > { %p990_p11 = por %p144_p10, %p56_p3  ;;  %s997_s28 = sand.u32 1, %s886_s14  }
  0x15   : > { %s647_s29 = sshll.u32 %s997_s28, 4  ;;  %s664_s30 = sshll.u32 %s894_s16, 8 }
  0x16   : > { %s1212_s27 = scalar_select %p990_p11, 1, 0 }
  0x17   : > { %s1006_s6 = scalar_lea.hbm %s1203_s0, %s664_s30  ;;  %s168_s7 = scalar_lea.vmem [#allocation2], %s647_s29 }
  0x18   : > { %s177_s8 = sshll.u32 %s168_s7, 4  ;;  %p1014_p0 = pnand %p685_p13, %p973_p4  ;;  %s1010_s8 = int_to_ptr.vmem [resolvable:$true] %s177_s8 }
  0x19   : > { %s165_s10 = scalar_lea.sflag [#allocation3], %s997_s28  ;;  %s752_s11 = scalar_lea.hbm %s1006_s6, 256 }
  0x1a   : > { %p753_p2 = scmp.ne.s32.totalorder %s1006_s6, %s752_s11  ;;  %p754_p3 = pneg %p1014_p0 }
  0x1b   : > { %s757_s21 = scalar_lea.hbm %s1203_s0, 512  ;;  %p758_p4 = scmp.lt.u32.totalorder %s1006_s6, %s1203_s0 }
  0x1c   : > { %p755_p5 = pnand %p754_p3, %p753_p2  ;;  %p759_p7 = scmp.lt.u32.totalorder %s757_s21, %s752_s11 }
  0x1d   : > { %p761_p13 = scmp.lt.u32.totalorder %s752_s11, %s1006_s6 }
  0x1e   : > { %p756_p6 = pneg %p755_p5  ;;  %p760_p10 = por %p759_p7, %p758_p4 }
  0x20   : > { %p762_p12 = por %p761_p13, %p760_p10 }
  0x22   : > { %p763_p1 = pnand %p762_p12, %p756_p6 }
  0x24   : > { %766 = shalt.err (!%p763_p1)
}
  0x25   : > { %s767_s4 = scalar_lea.vmem %s1010_s8, 256  ;;  %s900_s5 = smov [#allocation2]  }
  0x26   : > { %p768_p2 = scmp.ne.s32.totalorder %s1010_s8, %s767_s4  ;;  %s772_s7 = sshll.u32 %s900_s5, 4  ;;  %s773_s7 = int_to_ptr.vmem [resolvable:$false] %s772_s7 }
  0x27   : > { %s774_s18 = scalar_lea.vmem %s773_s7, 512  ;;  %p775_p9 = scmp.lt.s32.totalorder %s1010_s8, %s773_s7 }
  0x28   : > { %p770_p5 = pnand %p768_p2, %p754_p3  ;;  %p776_p4 = scmp.lt.s32.totalorder %s774_s18, %s767_s4 }
  0x2a   : > { %p771_p11 = pneg %p770_p5  ;;  %p777_p7 = por %p776_p4, %p775_p9 }
  0x2c   : > { %p778_p10 = pnand %p777_p7, %p771_p11 }
  0x2e   : > { %781 = shalt.err (!%p778_p10)
}
  0x2f   : > { %s901_s11 = smov 128   ;;  %s902_s19 = smov 8  }
  0x30   : > { %677 = dma.hbm_to_vmem [thread:$0]  (!%p1014_p0), %s1006_s6, 256, %s1010_s8, %s165_s10, %s901_s11, %s901_s11, %s902_s19  }
  0x31   : > { %p217_p9 = scmp.lt.s32.totalorder %s898_s17, 3  ;;  %s1056_s23 = scalar_lea.hbm %s1204_s1, %s664_s30 }
  0x32   : > { %p1214_p11 = scmp.ge.s32.totalorder %s898_s17, 1  ;;  %s191_s5 = scalar_lea.vmem [#allocation5], %s647_s29 }
  0x33   : > { %s200_s7 = sshll.u32 %s191_s5, 4  ;;  %s188_s6 = scalar_lea.sflag [#allocation6], %s997_s28  ;;  %s1066_s7 = int_to_ptr.vmem [resolvable:$true] %s200_s7 }
  0x34   : > { %p1060_p12 = pnand %p1214_p11, %p217_p9  ;;  %s782_s8 = scalar_lea.hbm %s1056_s23, 256 }
  0x35   : > { %p783_p1 = scmp.ne.s32.totalorder %s1056_s23, %s782_s8  ;;  %s787_s18 = scalar_lea.hbm %s1204_s1, 512 }
  0x36   : > { %p788_p2 = scmp.lt.u32.totalorder %s1056_s23, %s1204_s1  ;;  %p789_p5 = scmp.lt.u32.totalorder %s787_s18, %s782_s8 }
  0x37   : > { %p785_p6 = pnand %p783_p1, %p754_p3  ;;  %p791_p7 = scmp.lt.u32.totalorder %s782_s8, %s1056_s23 }
  0x38   : > { %p790_p4 = por %p789_p5, %p788_p2 }
  0x39   : > { %p786_p13 = pneg %p785_p6 }
  0x3a   : > { %p792_p10 = por %p791_p7, %p790_p4 }
  0x3c   : > { %p793_p9 = pnand %p792_p10, %p786_p13 }
  0x3e   : > { %796 = shalt.err (!%p793_p9)
}
  0x3f   : > { %s797_s29 = scalar_lea.vmem %s1066_s7, 256  ;;  %s903_s5 = smov [#allocation5]  }
  0x40   : > { %p798_p11 = scmp.ne.s32.totalorder %s1066_s7, %s797_s29  ;;  %s802_s30 = sshll.u32 %s903_s5, 4  ;;  %s803_s30 = int_to_ptr.vmem [resolvable:$false] %s802_s30 }
  0x41   : > { %s804_s10 = scalar_lea.vmem %s803_s30, 512  ;;  %p805_p8 = scmp.lt.s32.totalorder %s1066_s7, %s803_s30 }
  0x42   : > { %p800_p1 = pnand %p798_p11, %p754_p3  ;;  %p806_p2 = scmp.lt.s32.totalorder %s804_s10, %s797_s29 }
  0x44   : > { %p801_p6 = pneg %p800_p1  ;;  %p807_p5 = por %p806_p2, %p805_p8 }
  0x46   : > { %p808_p4 = pnand %p807_p5, %p801_p6 }
  0x48   : > { %811 = shalt.err (!%p808_p4)
}
  0x49   : > { %680 = dma.hbm_to_vmem [thread:$0]  (!%p1014_p0), %s1056_s23, 256, %s1066_s7, %s188_s6, %s901_s11, %s901_s11, %s902_s19  }
  0x4a   : > { %221 = sbr.rel (%p1060_p12) target bundleno = 921 (0x399), region = 32  ;;  %s1100_s8 = sand.u32 (!%p1060_p12), 1, %s882_s13  }
  0x4b   : > { %s654_s18 = sshll.u32 (!%p1060_p12), %s1100_s8, 4  ;;  %s224_s21 = scalar_lea.sflag (!%p1060_p12), [#allocation3], %s1100_s8 }
  0x4c   : > { %s1104_s9 = scalar_lea.vmem (!%p1060_p12), [#allocation2], %s654_s18  ;;  %p1216_p8 = scmp.ne.s32.totalorder (!%p1060_p12), %s1210_s24, 0 }
  0x51   : > { %865 = dma.done.wait (%p1216_p8), %s224_s21, 256  }
  0x52   : > { %867 = vsyncadd (%p1216_p8), %s224_s21, 4294967040  ;;  %s233_s28 = scalar_lea.sflag [#allocation6], %s1100_s8  ;;  %s236_s11 = scalar_lea.vmem [#allocation5], %s654_s18 }
  0x53   : > { %869 = dma.done.wait (%p1216_p8), %s233_s28, 256  }
  0x54   : > { %871 = vsyncadd (%p1216_p8), %s233_s28, 4294967040  ;;  %p271_p0 = scmp.lt.s32.totalorder %s890_s15, 1  ;;  %v1120_v0 = vld [vmem:[%s236_s11] sm:$0xff]  ;;  %vm284_vm0 = vcmask 1040384   ;;  %v1122_v2 = vld [vmem:[%s236_s11 + $0x8] sm:$0xff]  ;;  %s904_s24 = smov 16   ;;  %v293_v8 = vlaneseq }
  0x55   : > { %v285_v3 = vrot.slane %v1120_v0, 7  ;;  %v286_v4 = vrot.slane %v1122_v2, 7  ;;  %vm301_vm1 = vcmask 1047680   ;;  %v905_v12 = vmov 0.0   ;;  %s906_s22 = smov 1   ;;  %s907_s29 = smov 15  }
  0x56   : > { %s272_s19 = scalar_select %p271_p0, %s890_s15, 1  ;;  %v294_v9 = vand.u32 127, %v293_v8  ;;  %vm413_vm4 = vcmask 1041408   ;;  %vm401_vm5 = vcmask 1045504   ;;  %vm388_vm6 = vcmask 1046528  }
  0x57   : > { %v287_v7 = vsel %vm284_vm0, %v285_v3, %v286_v4  ;;  %s908_s5 = smov 14   ;;  %s909_s30 = smov 114   ;;  %vm498_vm11 = vcmask 130048  }
  0x58   : > { %s656_s23 = sshll.u32 %s272_s19, 1  ;;  %vm298_vm2 = vcmp.lt.s32.totalorder %v294_v9, 15  ;;  %vm295_vm3 = vcmp.gt.s32.totalorder %v294_v9, 0  ;;  %v350_v20 = vmul.f32 2.0, %v287_v7  ;;  %s910_s10 = smov 127  }
  0x59   : > { %s274_s6 = scalar_lea.vmem %s1205_s2, %s656_s23  ;;  %v658_v13 = vsel %vm298_vm2, 1.0, %v905_v12  ;;  %v657_v17 = vsel %vm295_vm3, 1.0, %v905_v12  ;;  %s267_s18 = scalar_lea.vmem [#allocation7], %s1100_s8 }
  0x5a   : > { %v281_v1 = vld [vmem:[%s274_s6] sm:$0x3]  ;;  %s527_s21 = sshll.u32 %s267_s18, 4  ;;  %s514_s4 = scalar_lea.sflag [#allocation4], %s1100_s8  ;;  %s1151_s21 = int_to_ptr.vmem [resolvable:$true] %s527_s21 }
  0x5b   : > { %v291_v5 = vsel %vm284_vm0, %v281_v1, %v285_v3  ;;  %v292_v6 = vsel %vm284_vm0, %v286_v4, %v281_v1  ;;  %s812_s7 = scalar_lea.vmem %s1151_s21, 16  ;;  %p1217_p12 = scmp.ne.s32.totalorder %s1211_s25, 0 }
  0x5c   : > { %302 = vrot.lane.b32.xlu0 %v291_v5, %s904_s24  ;;  %308 = vrot.lane.b32.xlu1 %v292_v6, %s904_s24  ;;  %v349_v19 = vmul.f32 2.0, %v291_v5  ;;  %v351_v28 = vmul.f32 2.0, %v292_v6  ;;  %p813_p3 = scmp.ne.s32.totalorder %s1151_s21, %s812_s7 }
  0x5e   : > { %p814_p13 = pnand %p813_p3, %p1217_p12 }
  0x60   : > { %305 = vrot.lane.b32.xlu0 %v287_v7, %s904_s24  ;;  %p815_p7 = pneg %p814_p13 }
  0xce   : > { %v303_v10 = vpop.permute.xlu0 %302  ;;  %v309_v15 = vpop.permute.xlu1 %308 }
  0xcf   : > { %v304_v11 = vsel %vm301_vm1, %v303_v10, %v291_v5  ;;  %v310_v18 = vsel %vm301_vm1, %v309_v15, %v292_v6 }
  0xd0   : > { %311 = vrot.lane.b32.xlu1 %v304_v11, %s904_s24 }
  0xd2   : > { %v306_v14 = vpop.permute.xlu0 %305 }
  0xd3   : > { %v307_v16 = vsel %vm301_vm1, %v306_v14, %v287_v7 }
  0xd4   : > { %328 = vrot.lane.b32.xlu1 %v658_v13, %s906_s22  ;;  %313 = vrot.lane.b32.xlu0 %v307_v16, %s904_s24 }
  0xd8   : > { %321 = vrot.lane.b32.xlu1 %v657_v17, %s907_s29  ;;  %315 = vrot.lane.b32.xlu0 %v310_v18, %s904_s24 }
  0xdc   : > { %355 = vrot.lane.b32.xlu0 %v349_v19, %s907_s29  ;;  %357 = vrot.lane.b32.xlu1 %v350_v20, %s907_s29 }
 0x142   : > { %v312_v21 = vpop.permute.xlu1 %311 }
 0x143   : > { %v317_v22 = vsel %vm301_vm1, %v312_v21, %v291_v5 }
 0x146   : > { %v329_v23 = vpop.permute.xlu1 %328  ;;  %v314_v24 = vpop.permute.xlu0 %313 }
 0x147   : > { %v331_v25 = vmul.f32 %v329_v23, %v317_v22  ;;  %v318_v26 = vsel %vm301_vm1, %v314_v24, %v287_v7 }
 0x148   : > { %v332_v27 = vmul.f32 %v329_v23, %v318_v26 }
 0x149   : > { %370 = vrot.lane.b32.xlu0 %v331_v25, %s908_s5 }
 0x14a   : > { %v316_v29 = vpop.permute.xlu0 %315  ;;  %372 = vrot.lane.b32.xlu1 %v332_v27, %s908_s5  ;;  %v322_v31 = vpop.permute.xlu1 %321 }
 0x14b   : > { %v319_v30 = vsel %vm301_vm1, %v316_v29, %v292_v6  ;;  %v324_v33 = vmul.f32 %v322_v31, %v317_v22  ;;  %v325_v34 = vmul.f32 %v322_v31, %v318_v26 }
 0x14c   : > { %v333_v32 = vmul.f32 %v329_v23, %v319_v30  ;;  %v326_v35 = vmul.f32 %v322_v31, %v319_v30 }
 0x14d   : > { %359 = vrot.lane.b32.xlu0 %v351_v28, %s907_s29 }
 0x14e   : > { %374 = vrot.lane.b32.xlu1 %v333_v32, %s908_s5  ;;  %v356_v36 = vpop.permute.xlu0 %355  ;;  %v358_v37 = vpop.permute.xlu1 %357 }
 0x14f   : > { %v364_v38 = vadd.f32 %v356_v36, %v324_v33  ;;  %v365_v39 = vadd.f32 %v358_v37, %v325_v34  ;;  %v277_v36 = vld [vmem:[%s1104_s9] sm:$0xff]  ;;  %v278_v37 = vld [vmem:[%s1104_s9 + $0x8] sm:$0xff]  ;;  %s661_s9 = sshll.u32 %s890_s15, 4  ;;  %s911_s15 = smov [#allocation7]  }
 0x150   : > { %s1156_s23 = scalar_lea.hbm %s1206_s3, %s661_s9  ;;  %s816_s6 = sshll.u32 %s911_s15, 4  ;;  %s817_s6 = int_to_ptr.vmem [resolvable:$false] %s816_s6 }
 0x151   : > { %337 = vrot.lane.b32.xlu0 %v324_v33, %s909_s30  ;;  %s818_s24 = scalar_lea.vmem %s817_s6, 32  ;;  %p819_p10 = scmp.lt.s32.totalorder %s1151_s21, %s817_s6 }
 0x152   : > { %339 = vrot.lane.b32.xlu1 %v325_v34, %s909_s30  ;;  %p820_p9 = scmp.lt.s32.totalorder %s818_s24, %s812_s7 }
 0x154   : > { %p821_p11 = por %p820_p9, %p819_p10 }
 0x155   : > { %341 = vrot.lane.b32.xlu0 %v326_v35, %s909_s30 }
 0x156   : > { %p822_p1 = pnand %p821_p11, %p815_p7 }
 0x1bb   : > { %v371_v40 = vpop.permute.xlu0 %370 }
 0x1bc   : > { %v379_v41 = vadd.f32 %v371_v40, %v364_v38  ;;  %v373_v42 = vpop.permute.xlu1 %372  ;;  %v460_v38 = vand.u32 2147483647, %v277_v36 }
 0x1bd   : > { %v380_v43 = vadd.f32 %v373_v42, %v365_v39  ;;  %v461_v39 = vand.u32 2147483647, %v278_v37 }
 0x1be   : > { %v414_v44 = vrot.slane %v379_v41, 6  ;;  %v462_v40 = vsub.f32 0.0, %v460_v38 }
 0x1bf   : > { %v415_v45 = vrot.slane %v380_v43, 6  ;;  %v360_v46 = vpop.permute.xlu0 %359 }
 0x1c0   : > { %v420_v47 = vsub.f32 %v379_v41, %v414_v44  ;;  %v366_v48 = vadd.f32 %v360_v46, %v326_v35  ;;  %v375_v49 = vpop.permute.xlu1 %374  ;;  %v463_v41 = vsub.f32 0.0, %v461_v39  ;;  %v464_v42 = vmul.f32 1.442695, %v462_v40 }
 0x1c1   : > { %v416_v50 = vsel %vm413_vm4, %v414_v44, %v415_v45 }
 0x1c2   : > { %v425_v51 = vmul.f32 %v420_v47, %v420_v47  ;;  %v421_v52 = vsub.f32 %v380_v43, %v416_v50  ;;  %v381_v53 = vadd.f32 %v375_v49, %v366_v48  ;;  %v466_v43 = vmul.f32 1.442695, %v463_v41 }
 0x1c3   : > { %v338_v62 = vpop.permute.xlu0 %337  ;;  %744 = vpow2.f32 %v464_v42 }
 0x1c4   : > { %v426_v54 = vmul.f32 %v421_v52, %v421_v52  ;;  %v422_v55 = vsub.f32 %v381_v53, %v415_v45  ;;  %v431_v56 = vrot.slane %v425_v51, 2  ;;  %v340_v63 = vpop.permute.xlu1 %339  ;;  %v346_v3 = vsub.f32 %v331_v25, %v338_v62 }
 0x1c5   : > { %v347_v4 = vsub.f32 %v332_v27, %v340_v63  ;;  %746 = vpow2.f32 %v466_v43 }
 0x1c6   : > { %v432_v57 = vrot.slane %v426_v54, 2  ;;  %v427_v58 = vmul.f32 %v422_v55, %v422_v55  ;;  %v382_v6 = vmul.f32 2.0, %v346_v3  ;;  %v402_v14 = vrot.slane %v346_v3, 2 }
 0x1c7   : > { %v342_v1 = vpop.permute.xlu0 %341  ;;  %v383_v7 = vmul.f32 2.0, %v347_v4  ;;  %v403_v15 = vrot.slane %v347_v4, 2  ;;  %v454_v54 = vmax.f32 %v277_v36, 0.0  ;;  %v456_v55 = vmul.f32 %v1120_v0, %v277_v36 }
 0x1c8   : > { %v434_v59 = vrot.slane %v427_v58, 2  ;;  %v433_v60 = vsel %vm401_vm5, %v431_v56, %v432_v57  ;;  %v348_v5 = vsub.f32 %v333_v32, %v342_v1  ;;  %v389_v9 = vrot.slane %v382_v6, 1 }
 0x1c9   : > { %436 = vrot.lane.b32.xlu1 %v433_v60, %s909_s30  ;;  %v390_v10 = vrot.slane %v383_v7, 1  ;;  %v404_v20 = vsel %vm401_vm5, %v402_v14, %v403_v15  ;;  %v457_v60 = vmul.f32 %v1122_v2, %v278_v37  ;;  %v458_v63 = vsub.f32 %v454_v54, %v456_v55 }
 0x1ca   : > { %v435_v61 = vsel %vm401_vm5, %v432_v57, %v434_v59  ;;  %v384_v8 = vmul.f32 2.0, %v348_v5  ;;  %v405_v18 = vrot.slane %v348_v5, 2  ;;  %v455_v59 = vmax.f32 %v278_v37, 0.0 }
 0x1cb   : > { %438 = vrot.lane.b32.xlu0 %v435_v61, %s909_s30  ;;  %v391_v13 = vsel %vm388_vm6, %v389_v9, %v390_v10 }
 0x1cc   : > { %v392_v11 = vrot.slane %v384_v8, 1  ;;  %v396_v17 = vadd.f32 %v391_v13, %v346_v3  ;;  %v406_v22 = vsel %vm401_vm5, %v403_v15, %v405_v18  ;;  %v459_v3 = vsub.f32 %v455_v59, %v457_v60 }
 0x1cd   : > { %v745_v44 = vpop.eup %744 }
 0x1ce   : > { %v393_v16 = vsel %vm388_vm6, %v390_v10, %v392_v11  ;;  %v409_v21 = vadd.f32 %v404_v20, %v396_v17  ;;  %v468_v46 = vadd.f32 1.0, %v745_v44  ;;  %v471_v47 = vmul.f32 -0.5, %v745_v44 }
 0x1cf   : > { %v397_v19 = vadd.f32 %v393_v16, %v347_v4  ;;  %v747_v45 = vpop.eup %746  ;;  %v474_v51 = vand.u32 2147483647, %v745_v44 }
 0x1d0   : > { %v423_v24 = vmul.f32 %v409_v21, %v409_v21  ;;  %748 = vlog2.f32 %v468_v46  ;;  %v480_v48 = vmul.f32 -0.5, %v747_v45  ;;  %v472_v49 = vadd.f32 1.0, %v471_v47 }
 0x1d1   : > { %v410_v23 = vadd.f32 %v406_v22, %v397_v19  ;;  %v483_v56 = vand.u32 2147483647, %v747_v45  ;;  %vm475_vm9 = vcmp.lt.f32.partialorder %v474_v51, 0.0004427343 }
 0x1d2   : > { %v481_v52 = vadd.f32 1.0, %v480_v48  ;;  %v473_v58 = vmul.f32 %v745_v44, %v472_v49 }
 0x1d3   : > { %v424_v27 = vmul.f32 %v410_v23, %v410_v23  ;;  %vm484_vm10 = vcmp.lt.f32.partialorder %v483_v56, 0.0004427343 }
 0x1d4   : > { %v482_v62 = vmul.f32 %v747_v45, %v481_v52 }
 0x1da   : > { %v749_v50 = vpop.eup %748 }
 0x1db   : > { %v470_v57 = vmul.f32 0.6931472, %v749_v50 }
 0x1dd   : > { %v476_v1 = vsel %vm475_vm9, %v473_v58, %v470_v57 }
 0x1de   : > { %v486_v5 = vadd.f32 %v476_v1, %v458_v63 }
 0x23b   : > { %v437_v25 = vpop.permute.xlu1 %436 }
 0x23c   : > { %v442_v26 = vadd.f32 %v437_v25, %v423_v24 }
 0x23d   : > { %v439_v28 = vpop.permute.xlu0 %438 }
 0x23e   : > { %vm444_vm7 = vcmp.gt.f32.partialorder %v442_v26, 0.25  ;;  %v443_v29 = vadd.f32 %v439_v28, %v424_v27 }
 0x23f   : > { %v659_v30 = vsel %vm444_vm7, 1.0, %v905_v12 }
 0x240   : > { %v450_v31 = vmul.f32 3.0, %v659_v30  ;;  %vm445_vm8 = vcmp.gt.f32.partialorder %v443_v29, 0.25 }
 0x241   : > { %v660_v32 = vsel %vm445_vm8, 1.0, %v905_v12  ;;  %v477_v12 = vadd.f32 1.0, %v747_v45 }
 0x242   : > { %v452_v33 = vadd.f32 1.0, %v450_v31  ;;  %v451_v34 = vmul.f32 3.0, %v660_v32 }
 0x243   : > { %750 = vlog2.f32 %v477_v12 }
 0x244   : > { %v453_v35 = vadd.f32 1.0, %v451_v34  ;;  %490 = vrot.lane.b32.xlu1 %v452_v33, %s910_s10 }
 0x246   : > { %492 = vrot.lane.b32.xlu0 %v453_v35, %s910_s10 }
 0x24d   : > { %v751_v53 = vpop.eup %750 }
 0x24e   : > { %v479_v61 = vmul.f32 0.6931472, %v751_v53 }
 0x250   : > { %v485_v4 = vsel %vm484_vm10, %v482_v62, %v479_v61 }
 0x251   : > { %v487_v6 = vadd.f32 %v485_v4, %v459_v3 }
 0x2b6   : > { %v491_v7 = vpop.permute.xlu1 %490 }
 0x2b7   : > { %v496_v8 = vmul.f32 %v491_v7, %v486_v5 }
 0x2b8   : > { %v493_v0 = vpop.permute.xlu0 %492 }
 0x2b9   : > { %v497_v9 = vmul.f32 %v493_v0, %v487_v6  ;;  %v499_v10 = vsel %vm498_vm11, %v496_v8, 0.0 }
 0x2bb   : > { %v500_v11 = vsel %vm498_vm11, %v497_v9, 0.0 }
 0x2bc   : > { %v501_v13 = vadd.f32 %v500_v11, %v499_v10 }
 0x2be   : > { %502 = vadd.xlane.f32.xlu1 %v501_v13 }
 0x34b   : > { %v503_v2 = vpop.xlane.xlu1 %502 }
 0x34c   : > { %v504_v14 = vrot.slane %v503_v2, 4 }
 0x34e   : > { %v505_v15 = vadd.f32 %v504_v14, %v503_v2 }
 0x350   : > { %v506_v16 = vrot.slane %v505_v15, 2 }
 0x352   : > { %v507_v17 = vadd.f32 %v506_v16, %v505_v15 }
 0x354   : > { %v508_v18 = vrot.slane %v507_v17, 1 }
 0x356   : > { %v509_v19 = vadd.f32 %v508_v18, %v507_v17 }
 0x358   : > { %666 = vpush %v509_v19 }
 0x389   : > { %s667_s28 = spop %666 }
 0x38a   : > { %v511_v20 = vstv %s667_s28 }
 0x38b   : > { %512 = vst [vmem:[%s267_s18] sm:$0x1] %v511_v20 }
 0x38c   : > { %825 = shalt.err (!%p822_p1)
}
 0x38d   : > { %s826_s8 = scalar_lea.hbm %s1156_s23, 16  ;;  %s830_s5 = scalar_lea.hbm %s1206_s3, 32 }
 0x38e   : > { %p827_p6 = scmp.ne.s32.totalorder %s1156_s23, %s826_s8  ;;  %p831_p4 = scmp.lt.u32.totalorder %s1156_s23, %s1206_s3 }
 0x38f   : > { %p832_p8 = scmp.lt.u32.totalorder %s830_s5, %s826_s8  ;;  %p834_p3 = scmp.lt.u32.totalorder %s826_s8, %s1156_s23 }
 0x390   : > { %p828_p2 = pnand %p827_p6, %p1217_p12 }
 0x391   : > { %p833_p0 = por %p832_p8, %p831_p4 }
 0x392   : > { %p829_p5 = pneg %p828_p2 }
 0x393   : > { %p835_p13 = por %p834_p3, %p833_p0 }
 0x395   : > { %p836_p7 = pnand %p835_p13, %p829_p5 }
 0x397   : > { %839 = shalt.err (!%p836_p7)
}
 0x398   : > { %672 = dma.vmem_to_hbm [thread:$0]  (%p1217_p12), %s1151_s21, 16, %s1156_s23, %s514_s4  }
 0x399 PF: > { %s539_s18 = sand.u32 1, %s878_s12   ;;  %p1218_p10 = scmp.ne.s32.totalorder %s1212_s27, 0 }
 0x39a   : > { %p1219_p9 = scmp.ge.s32.totalorder %s898_s17, 2  ;;  %s540_s9 = scalar_lea.sflag [#allocation4], %s539_s18 }
 0x39c   : > { %p682_p11 = pnand %p1219_p9, %p1218_p10 }
 0x39e   : > { %873 = dma.done.wait (!%p682_p11), %s540_s9, 16  }
 0x39f   : > { %875 = vsyncadd (!%p682_p11), %s540_s9, 4294967280  ;;  %s22_s17 = sadd.s32 1, %s898_s17   ;;  %s1220_s12 = smov %s882_s13 }
 0x3a0   : > { %p19_p1 = scmp.ge.s32.totalorder %s22_s17, 4   ;;  %s1221_s13 = smov %s886_s14 }
 0x3a1   : > { %s1222_s14 = smov %s988_s26  ;;  %s1223_s15 = smov %s894_s16 }
 0x3a2   : > { %s1224_s16 = smov %s1226_s20  ;;  %21 = sbr.rel (!%p19_p1) target bundleno = 8 (0x8), region = 93 }
 0x3a9   :  { %544 = vsyncpa [#allocation3], 1 }
 0x3aa   :  { %546 = vsyncpa [#allocation3 + $0x1], 1 }
 0x3ab   :  { %547 = vsyncpa [#allocation6], 1 }
 0x3ac   :  { %549 = vsyncpa [#allocation6 + $0x1], 1 }
 0x3ad   :  { %550 = vsyncpa [#allocation4], 1 }
 0x3ae   :  { %552 = vsyncpa [#allocation4 + $0x1], 1 }

</bundles_post_ra>
